<compile_context>
chip_gen: v7x
topology: tpu7x:2x2x1
jax: 0.10.0
libtpu: 0.0.40
codegen_flags: <defaults>
</compile_context>

<pallas_src>
import jax
import jax.numpy as jnp
from jax.experimental import pallas as pl
from jax.experimental.pallas import tpu as pltpu

KCAL_PER_EV = 23.061


def siamese_kernel(x1_ref, x2_ref, w1_ref, b1_ref, w2_ref, diff_ref):
    """Fused siamese forward for one batch tile.

    x1_ref/x2_ref: (TB, D) f32, w1_ref: (D, H) bf16, b1_ref: (1, H) f32,
    w2_ref: (H, Pp) f32 (col 0 of mol_prop dropped, zero-padded to Pp lanes),
    diff_ref: (TB, Pp) f32.
    """
    # In-kernel bf16 cast (VPU) -> avoids a separate wrapper cast pass over HBM.
    x1 = x1_ref[...].astype(jnp.bfloat16)
    x2 = x2_ref[...].astype(jnp.bfloat16)
    w1 = w1_ref[...]
    b1 = b1_ref[...]

    # Shared first layer: two MXU passes against the same weights (no concat copy).
    h1 = jnp.maximum(jnp.dot(x1, w1, preferred_element_type=jnp.float32) + b1, 0.0)
    h2 = jnp.maximum(jnp.dot(x2, w1, preferred_element_type=jnp.float32) + b1, 0.0)

    # Linearity of the head: (h2@w2 + b2) - (h1@w2 + b2) = (h2 - h1) @ w2,
    # so b2 cancels. Keep this matmul in f32 (cheap: lane-padded, tiny N).
    dh = h2 - h1                                                      # f32 [TB, H]
    out = jnp.dot(dh, w2_ref[...], preferred_element_type=jnp.float32)  # f32 [TB, Pp]
    diff_ref[...] = out * jnp.float32(KCAL_PER_EV)


def siamese_forward(x1, x2, params, *, block_b=512, core_parallel=False):
    """Batch-tiled pallas_call wrapper.

    block_b: batch tile (large tiles preferred on single-TC v5e/v6e).
    core_parallel: set True on v7x with an even grid so both TCs get tiles.
    """
    B, D = x1.shape
    H = params["w1"].shape[1]
    P = params["w2"].shape[1]
    Pm1 = P - 1
    Pp = max(128, ((Pm1 + 127) // 128) * 128)   # lane-dense padded output width

    # Weights: w1 pre-cast to bf16 (MXU path), b1 f32, head weight folded
    # ([:, 1:]) and zero-padded to Pp lanes, kept f32 for the f32 head matmul.
    w1b = params["w1"].astype(jnp.bfloat16)
    b1f = params["b1"].astype(jnp.float32).reshape(1, H)
    w2f = params["w2"].astype(jnp.float32)[:, 1:]
    w2p = jnp.pad(w2f, ((0, 0), (0, Pp - Pm1)))

    # Pick the batch tile; pad ragged batches to a tile multiple.
    tb = min(block_b, B)
    Bp = ((B + tb - 1) // tb) * tb
    if Bp != B:
        x1 = jnp.pad(x1, ((0, Bp - B), (0, 0)))
        x2 = jnp.pad(x2, ((0, Bp - B), (0, 0)))
    grid = (Bp // tb,)

    x_spec = pl.BlockSpec((tb, D), lambda i: (i, 0))        # pipelined batch tiles
    # Constant index_map -> weights fetched once and stay VMEM resident.
    # TODO(synk): for a large real base_network, single-buffer these weight specs
    # (pipeline_mode=pl.Buffered(1)) to halve resident-weight VMEM on v7x (64 MiB/TC).
    resident = lambda shape: pl.BlockSpec(shape, lambda i: (0, 0))

    batch_sem = pltpu.CORE_PARALLEL if core_parallel else "parallel"

    flops = 4 * Bp * D * H + 2 * Bp * H * Pp
    bytes_accessed = (2 * Bp * D * 4          # x1, x2 (f32)
                      + D * H * 2 + H * 4     # w1 (bf16), b1 (f32)
                      + H * Pp * 4            # w2 padded (f32)
                      + Bp * Pp * 4)          # output (f32)

    out = pl.pallas_call(
        siamese_kernel,
        out_shape=jax.ShapeDtypeStruct((Bp, Pp), jnp.float32),
        grid=grid,
        in_specs=[
            x_spec,                 # x1 tile (f32, cast in-kernel)
            x_spec,                 # x2 tile
            resident((D, H)),       # w1 (bf16)
            resident((1, H)),       # b1 (f32)
            resident((H, Pp)),      # w2 (f32, folded + lane-padded)
        ],
        out_specs=pl.BlockSpec((tb, Pp), lambda i: (i, 0)),
        compiler_params=pltpu.CompilerParams(
            dimension_semantics=(batch_sem,),
            vmem_limit_bytes=32 * 1024 * 1024,   # safe on v7x (64 MiB physical)
        ),
        cost_estimate=pl.CostEstimate(flops=flops, transcendentals=0,
                                      bytes_accessed=bytes_accessed),
    )(x1, x2, w1b, b1f, w2p)

    # Drop batch padding and the zero-padded output lanes outside the kernel.
    return out[:B, :Pm1]


def make_params(key, d_in, d_hidden, d_prop):
    """Deterministic synthetic parameters for the base network."""
    k1, k2, k3, k4 = jax.random.split(key, 4)
    return {
        "w1": jax.random.normal(k1, (d_in, d_hidden), jnp.float32) * 0.1,
        "b1": jax.random.normal(k2, (1, d_hidden), jnp.float32) * 0.01,
        "w2": jax.random.normal(k3, (d_hidden, d_prop), jnp.float32) * 0.1,
        "b2": jax.random.normal(k4, (1, d_prop), jnp.float32) * 0.01,
    }


def reference_forward_f32(x1, x2, params):
    """Pure-f32 JAX reference matching the PyTorch module semantics."""
    def base(x):
        h = jnp.maximum(x @ params["w1"] + params["b1"], 0.0)
        return h @ params["w2"] + params["b2"]
    return (base(x2)[:, 1:] - base(x1)[:, 1:]) * KCAL_PER_EV


def reference_forward_matched(x1, x2, params):
    """Matched-precision reference (bf16 first layer / f32 accum, f32 head)."""
    w1b = params["w1"].astype(jnp.bfloat16)

    def hidden(x):
        h = jnp.dot(x.astype(jnp.bfloat16), w1b, preferred_element_type=jnp.float32)
        return jnp.maximum(h + params["b1"].astype(jnp.float32), 0.0)

    dh = hidden(x2) - hidden(x1)
    w2f = params["w2"].astype(jnp.float32)[:, 1:]
    return jnp.dot(dh, w2f, precision=jax.lax.Precision.HIGHEST,
                   preferred_element_type=jnp.float32) * KCAL_PER_EV


if __name__ == "__main__":
    key = jax.random.PRNGKey(0)
    k_params, k_x1, k_x2 = jax.random.split(key, 3)

    # Small shapes consistent with the module (batch of molecule feature vectors).
    B, D, H, P = 256, 32, 64, 8
    params = make_params(k_params, D, H, P)
    x1 = jax.random.normal(k_x1, (B, D), jnp.float32)
    x2 = jax.random.normal(k_x2, (B, D), jnp.float32)

    diff = jax.block_until_ready(siamese_forward(x1, x2, params))
    assert diff.shape == (B, P - 1), diff.shape

    # Tight check vs. a matched-precision JAX reference.
    ref_m = reference_forward_matched(x1, x2, params)
    assert jnp.allclose(diff, ref_m, atol=1e-2, rtol=1e-3), "mismatch vs matched reference"

    # Loose sanity check vs. the full-f32 reference (first-layer bf16 rounding only).
    ref_f32 = reference_forward_f32(x1, x2, params)
    err = jnp.max(jnp.abs(diff - ref_f32))
    scale = jnp.max(jnp.abs(ref_f32)) + 1e-6
    assert err <= 0.03 * scale, (err, scale)

    print("KERNEL_OK")
</pallas_src>

<mosaic_0001>
module attributes {stable_mosaic.version = 11 : i64} {
  func.func @siamese_kernel(%arg0: i32, %arg1: memref<256x32xf32, #tpu.memory_space<vmem>>, %arg2: memref<256x32xf32, #tpu.memory_space<vmem>>, %arg3: memref<32x64xbf16, #tpu.memory_space<vmem>>, %arg4: memref<1x64xf32, #tpu.memory_space<vmem>>, %arg5: memref<64x128xf32, #tpu.memory_space<vmem>>, %arg6: memref<256x128xf32, #tpu.memory_space<vmem>>) attributes {dimension_semantics = [#tpu.dimension_semantics<parallel>], iteration_bounds = array<i64: 1>, scalar_prefetch = 0 : i64, scratch_operands = 0 : i64, tpu.core_type = #tpu.core_type<tc>, window_params = [{transform_indices = @transform_0, window_bounds = array<i64: 256, 32>}, {transform_indices = @transform_1, window_bounds = array<i64: 256, 32>}, {pipeline_mode = #tpu.pipeline_mode<synchronous>, transform_indices = @transform_2, window_bounds = array<i64: 32, 64>}, {pipeline_mode = #tpu.pipeline_mode<synchronous>, transform_indices = @transform_3, window_bounds = array<i64: 1, 64>}, {pipeline_mode = #tpu.pipeline_mode<synchronous>, transform_indices = @transform_4, window_bounds = array<i64: 64, 128>}, {transform_indices = @transform_5, window_bounds = array<i64: 256, 128>}]} {
    %c0 = arith.constant 0 : index
    %c0_0 = arith.constant 0 : index
    %0 = vector.load %arg1[%c0, %c0_0] : memref<256x32xf32, #tpu.memory_space<vmem>>, vector<256x32xf32>
    %1 = arith.truncf %0 : vector<256x32xf32> to vector<256x32xbf16>
    %c0_1 = arith.constant 0 : index
    %c0_2 = arith.constant 0 : index
    %2 = vector.load %arg2[%c0_1, %c0_2] : memref<256x32xf32, #tpu.memory_space<vmem>>, vector<256x32xf32>
    %3 = arith.truncf %2 : vector<256x32xf32> to vector<256x32xbf16>
    %c0_3 = arith.constant 0 : index
    %c0_4 = arith.constant 0 : index
    %4 = vector.load %arg3[%c0_3, %c0_4] : memref<32x64xbf16, #tpu.memory_space<vmem>>, vector<32x64xbf16>
    %c0_5 = arith.constant 0 : index
    %c0_6 = arith.constant 0 : index
    %5 = vector.load %arg4[%c0_5, %c0_6] : memref<1x64xf32, #tpu.memory_space<vmem>>, vector<1x64xf32>
    %cst = arith.constant dense<0.000000e+00> : vector<256x64xf32>
    %6 = tpu.matmul %1, %4, %cst {dimension_numbers = #tpu.dot_dimension_numbers<[1], [0], [0], [1], [0, 0, 1, 1], [], []>} : vector<256x32xbf16>, vector<32x64xbf16>, vector<256x64xf32> -> vector<256x64xf32>
    %7 = vector.broadcast %5 : vector<1x64xf32> to vector<256x64xf32>
    %8 = arith.addf %6, %7 : vector<256x64xf32>
    %cst_7 = arith.constant 0.000000e+00 : f32
    %9 = vector.broadcast %cst_7 : f32 to vector<256x64xf32>
    %10 = arith.maximumf %8, %9 : vector<256x64xf32>
    %cst_8 = arith.constant dense<0.000000e+00> : vector<256x64xf32>
    %11 = tpu.matmul %3, %4, %cst_8 {dimension_numbers = #tpu.dot_dimension_numbers<[1], [0], [0], [1], [0, 0, 1, 1], [], []>} : vector<256x32xbf16>, vector<32x64xbf16>, vector<256x64xf32> -> vector<256x64xf32>
    %12 = vector.broadcast %5 : vector<1x64xf32> to vector<256x64xf32>
    %13 = arith.addf %11, %12 : vector<256x64xf32>
    %cst_9 = arith.constant 0.000000e+00 : f32
    %14 = vector.broadcast %cst_9 : f32 to vector<256x64xf32>
    %15 = arith.maximumf %13, %14 : vector<256x64xf32>
    %16 = arith.subf %15, %10 : vector<256x64xf32>
    %c0_10 = arith.constant 0 : index
    %c0_11 = arith.constant 0 : index
    %17 = vector.load %arg5[%c0_10, %c0_11] : memref<64x128xf32, #tpu.memory_space<vmem>>, vector<64x128xf32>
    %cst_12 = arith.constant dense<0.000000e+00> : vector<256x128xf32>
    %18 = tpu.matmul %16, %17, %cst_12 {dimension_numbers = #tpu.dot_dimension_numbers<[1], [0], [0], [1], [0, 0, 1, 1], [], []>} : vector<256x64xf32>, vector<64x128xf32>, vector<256x128xf32> -> vector<256x128xf32>
    %cst_13 = arith.constant 2.306100e+01 : f32
    %19 = vector.broadcast %cst_13 : f32 to vector<256x128xf32>
    %20 = arith.mulf %18, %19 : vector<256x128xf32>
    %c0_14 = arith.constant 0 : index
    %c0_15 = arith.constant 0 : index
    %21 = vector.load %arg6[%c0_14, %c0_15] : memref<256x128xf32, #tpu.memory_space<vmem>>, vector<256x128xf32>
    tpu.vector_store %arg6[%c0_14, %c0_15], %20 {strides = array<i32>} : memref<256x128xf32, #tpu.memory_space<vmem>>, vector<256x128xf32>,
    return
  }
  func.func @transform_0(%arg0: i32) -> (i32, i32) {
    %c0_i32 = arith.constant 0 : i32
    %c0_i32_0 = arith.constant 0 : i32
    return %arg0, %c0_i32 : i32, i32
  }
  func.func @transform_1(%arg0: i32) -> (i32, i32) {
    %c0_i32 = arith.constant 0 : i32
    %c0_i32_0 = arith.constant 0 : i32
    return %arg0, %c0_i32 : i32, i32
  }
  func.func @transform_2(%arg0: i32) -> (i32, i32) {
    %c0_i32 = arith.constant 0 : i32
    %c0_i32_0 = arith.constant 0 : i32
    %c0_i32_1 = arith.constant 0 : i32
    return %c0_i32, %c0_i32_0 : i32, i32
  }
  func.func @transform_3(%arg0: i32) -> (i32, i32) {
    %c0_i32 = arith.constant 0 : i32
    %c0_i32_0 = arith.constant 0 : i32
    %c0_i32_1 = arith.constant 0 : i32
    return %c0_i32, %c0_i32_0 : i32, i32
  }
  func.func @transform_4(%arg0: i32) -> (i32, i32) {
    %c0_i32 = arith.constant 0 : i32
    %c0_i32_0 = arith.constant 0 : i32
    %c0_i32_1 = arith.constant 0 : i32
    return %c0_i32, %c0_i32_0 : i32, i32
  }
  func.func @transform_5(%arg0: i32) -> (i32, i32) {
    %c0_i32 = arith.constant 0 : i32
    %c0_i32_0 = arith.constant 0 : i32
    return %arg0, %c0_i32 : i32, i32
  }
}

</mosaic_0001>

<bundles_post_ra>
// kernel: tpu_custom_call.1
= control target key start
LH: loop header
LB: loop body
LE: loop exit
PB: predicated region body
PF: predicated region fallthrough
CT: control target
= control target key end

     0   :  { %vm141_vm0 = vcmask 261120   ;;  %s1863_s0 = inlined_call_operand.vmem [shape: f32[256,32], index: 0, kind: input, shape index: {}]   ;;  %s1864_s1 = inlined_call_operand.vmem [shape: f32[256,32], index: 1, kind: input, shape index: {}]   ;;  %s1865_s2 = inlined_call_operand.vmem [shape: bf16[32,64], index: 2, kind: input, shape index: {}]   ;;  %s1866_s3 = inlined_call_operand.vmem [shape: f32[1,64], index: 3, kind: input, shape index: {}]   ;;  %s1867_s4 = inlined_call_operand.vmem [shape: f32[64,128], index: 4, kind: input, shape index: {}]   ;;  %s1868_s5 = inlined_call_operand.hbm [shape: f32[256,128], index: 5, kind: output, shape index: {}]  }
   0x1   :  { %v1368_v0 = vld [vmem:[%s1865_s2] sm:$0xff]   ;;  %v1369_v1 = vld [vmem:[%s1865_s2 + $0x8] sm:$0xff]   ;;  %v40_v5 = vld [vmem:[%s1863_s0 + $0x90] sm:$0xff] }
   0x2   :  { %1361 = vmatprep.subr.bf16.mxu1 %v1368_v0  ;;  %v38_v2 = vld [vmem:[%s1863_s0 + $0x80] sm:$0xff]  ;;  %v39_v3 = vld [vmem:[%s1863_s0 + $0x88] sm:$0xff]  ;;  %1209 = vmatprep.subr.bf16.mxu0 %v1368_v0  ;;  %v41_v6 = vld [vmem:[%s1863_s0 + $0x98] sm:$0xff] }
   0x3   :  { %1363 = vmatpush3.bf16.msra.mxu1 %v1368_v0  ;;  %v62_v4 = vpack.c.bf16 %v39_v3, %v38_v2  ;;  %1210 = vmatpush3.bf16.msra.mxu0 %v1368_v0  ;;  %v42_v7 = vld [vmem:[%s1863_s0 + $0xa0] sm:$0xff]  ;;  %v43_v8 = vld [vmem:[%s1863_s0 + $0xa8] sm:$0xff]  ;;  %v63_v9 = vpack.c.bf16 %v41_v6, %v40_v5  ;;  %v24_v14 = vld [vmem:[%s1863_s0 + $0x10] sm:$0xff] }
   0x4   :  { %1362 = vmatprep.subr.bf16.mxu1 %v1369_v1  ;;  %1211 = vmatprep.subr.bf16.mxu0 %v1369_v1  ;;  %v64_v10 = vpack.c.bf16 %v43_v8, %v42_v7  ;;  %v22_v11 = vld [vmem:[%s1863_s0] sm:$0xff]  ;;  %v23_v12 = vld [vmem:[%s1863_s0 + $0x8] sm:$0xff]  ;;  %v25_v15 = vld [vmem:[%s1863_s0 + $0x18] sm:$0xff] }
   0x5   :  { %1229 = vmatprep.mubr.msk.bf16.mxu1 %vm141_vm0, %v62_v4  ;;  %v54_v13 = vpack.c.bf16 %v23_v12, %v22_v11  ;;  %v55_v16 = vpack.c.bf16 %v25_v15, %v24_v14  ;;  %v26_v17 = vld [vmem:[%s1863_s0 + $0x20] sm:$0xff]  ;;  %v27_v18 = vld [vmem:[%s1863_s0 + $0x28] sm:$0xff]  ;;  %v44_v19 = vld [vmem:[%s1863_s0 + $0xb0] sm:$0xff] }
   0x6   :  { %v45_v20 = vld [vmem:[%s1863_s0 + $0xb8] sm:$0xff]  ;;  %v56_v21 = vpack.c.bf16 %v27_v18, %v26_v17  ;;  %v46_v22 = vld [vmem:[%s1863_s0 + $0xc0] sm:$0xff]  ;;  %v47_v23 = vld [vmem:[%s1863_s0 + $0xc8] sm:$0xff] }
   0x7   :  { %1364 = vmatpush3.bf16.msra.mxu1 %v1369_v1  ;;  %1212 = vmatpush3.bf16.msra.mxu0 %v1369_v1  ;;  %v28_v24 = vld [vmem:[%s1863_s0 + $0x30] sm:$0xff]  ;;  %v29_v25 = vld [vmem:[%s1863_s0 + $0x38] sm:$0xff]  ;;  %v65_v26 = vpack.c.bf16 %v45_v20, %v44_v19  ;;  %v30_v27 = vld [vmem:[%s1863_s0 + $0x40] sm:$0xff]  ;;  %v66_v29 = vpack.c.bf16 %v47_v23, %v46_v22 }
   0x8   :  { %1245 = vmatprep.subr.bf16.mxu1 %v1368_v0  ;;  %1213 = vmatprep.mubr.msk.bf16.mxu0 %vm141_vm0, %v54_v13  ;;  %v31_v28 = vld [vmem:[%s1863_s0 + $0x48] sm:$0xff]  ;;  %v57_v30 = vpack.c.bf16 %v29_v25, %v28_v24  ;;  %v48_v32 = vld [vmem:[%s1863_s0 + $0xd0] sm:$0xff]  ;;  %v49_v33 = vld [vmem:[%s1863_s0 + $0xd8] sm:$0xff] }
   0x9   :  { %v58_v31 = vpack.c.bf16 %v31_v28, %v30_v27  ;;  %v50_v34 = vld [vmem:[%s1863_s0 + $0xe0] sm:$0xff]  ;;  %v51_v35 = vld [vmem:[%s1863_s0 + $0xe8] sm:$0xff]  ;;  %v32_v36 = vld [vmem:[%s1863_s0 + $0x50] sm:$0xff]  ;;  %v67_v38 = vpack.c.bf16 %v49_v33, %v48_v32 }
   0xa   :  { %1230 = vmatmul.mubr.msk.bf16.vlgmr.msra.gmra.mrb[0].mxu1 %vm141_vm0, %v63_v9  ;;  %1214 = vmatmul.mubr.msk.bf16.vlgmr.msra.gmra.mrb[0].mxu0 %vm141_vm0, %v55_v16  ;;  %v33_v37 = vld [vmem:[%s1863_s0 + $0x58] sm:$0xff]  ;;  %v34_v39 = vld [vmem:[%s1863_s0 + $0x60] sm:$0xff]  ;;  %v35_v40 = vld [vmem:[%s1863_s0 + $0x68] sm:$0xff]  ;;  %v68_v41 = vpack.c.bf16 %v51_v35, %v50_v34 }
   0xb   :  { %1246 = vmatpush3.bf16.msra.mxu1 %v1368_v0  ;;  %1233 = vmatprep.mubr.msk.bf16.mxu1 %vm141_vm0, %v64_v10 }
   0xc   :  { %1247 = vmatprep.subr.bf16.mxu1 %v1369_v1  ;;  %1217 = vmatprep.mubr.msk.bf16.mxu0 %vm141_vm0, %v56_v21 }
   0xf   :  { %1248 = vmatpush3.bf16.msra.mxu1 %v1369_v1 }
  0x12   :  { %1234 = vmatmul.mubr.msk.bf16.gmra.mrb[4].mxu1 %vm141_vm0, %v65_v26  ;;  %1218 = vmatmul.mubr.msk.bf16.gmra.mrb[4].mxu0 %vm141_vm0, %v57_v30 }
  0x13   :  { %1237 = vmatprep.mubr.msk.bf16.mxu1 %vm141_vm0, %v66_v29  ;;  %1221 = vmatprep.mubr.msk.bf16.mxu0 %vm141_vm0, %v58_v31 }
  0x14   :  { %10 = vsyncpa [#allocation3], 0  ;;  %v59_v42 = vpack.c.bf16 %v33_v37, %v32_v36  ;;  %v60_v43 = vpack.c.bf16 %v35_v40, %v34_v39  ;;  %v52_v44 = vld [vmem:[%s1863_s0 + $0xf0] sm:$0xff]  ;;  %v53_v45 = vld [vmem:[%s1863_s0 + $0xf8] sm:$0xff]  ;;  %vm664_vm1 = vcmask 523264  }
  0x15   :  { %v70_v46 = vld [vmem:[%s1864_s1] sm:$0xff]  ;;  %v71_v47 = vld [vmem:[%s1864_s1 + $0x8] sm:$0xff]  ;;  %v36_v48 = vld [vmem:[%s1863_s0 + $0x70] sm:$0xff]  ;;  %v69_v50 = vpack.c.bf16 %v53_v45, %v52_v44 }
  0x16   :  { %v37_v49 = vld [vmem:[%s1863_s0 + $0x78] sm:$0xff]  ;;  %v102_v51 = vpack.c.bf16 %v71_v47, %v70_v46  ;;  %v72_v53 = vld [vmem:[%s1864_s1 + $0x10] sm:$0xff]  ;;  %v74_v55 = vld [vmem:[%s1864_s1 + $0x20] sm:$0xff] }
  0x17   :  { %v61_v52 = vpack.c.bf16 %v37_v49, %v36_v48  ;;  %v73_v54 = vld [vmem:[%s1864_s1 + $0x18] sm:$0xff]  ;;  %v75_v56 = vld [vmem:[%s1864_s1 + $0x28] sm:$0xff]  ;;  %v76_v59 = vld [vmem:[%s1864_s1 + $0x30] sm:$0xff] }
  0x18   :  { %v103_v57 = vpack.c.bf16 %v73_v54, %v72_v53  ;;  %v104_v58 = vpack.c.bf16 %v75_v56, %v74_v55  ;;  %v77_v60 = vld [vmem:[%s1864_s1 + $0x38] sm:$0xff]  ;;  %v78_v61 = vld [vmem:[%s1864_s1 + $0x40] sm:$0xff]  ;;  %v79_v62 = vld [vmem:[%s1864_s1 + $0x48] sm:$0xff] }
  0x19   :  { %v105_v63 = vpack.c.bf16 %v77_v60, %v76_v59  ;;  %v106_v0 = vpack.c.bf16 %v79_v62, %v78_v61  ;;  %v80_v1 = vld [vmem:[%s1864_s1 + $0x50] sm:$0xff]  ;;  %v81_v2 = vld [vmem:[%s1864_s1 + $0x58] sm:$0xff]  ;;  %v82_v3 = vld [vmem:[%s1864_s1 + $0x60] sm:$0xff] }
  0x1a   :  { %1238 = vmatmul.mubr.msk.bf16.gmra.mrb[8].mxu1 %vm141_vm0, %v67_v38  ;;  %1222 = vmatmul.mubr.msk.bf16.gmra.mrb[8].mxu0 %vm141_vm0, %v59_v42  ;;  %v83_v4 = vld [vmem:[%s1864_s1 + $0x68] sm:$0xff]  ;;  %v107_v5 = vpack.c.bf16 %v81_v2, %v80_v1  ;;  %v84_v7 = vld [vmem:[%s1864_s1 + $0x70] sm:$0xff]  ;;  %v85_v8 = vld [vmem:[%s1864_s1 + $0x78] sm:$0xff] }
  0x1b   :  { %1241 = vmatprep.mubr.msk.bf16.mxu1 %vm141_vm0, %v68_v41  ;;  %1225 = vmatprep.mubr.msk.bf16.mxu0 %vm141_vm0, %v60_v43  ;;  %v108_v6 = vpack.c.bf16 %v83_v4, %v82_v3  ;;  %v86_v9 = vld [vmem:[%s1864_s1 + $0x80] sm:$0xff]  ;;  %v87_v10 = vld [vmem:[%s1864_s1 + $0x88] sm:$0xff]  ;;  %v109_v11 = vpack.c.bf16 %v85_v8, %v84_v7  ;;  %v88_v13 = vld [vmem:[%s1864_s1 + $0x90] sm:$0xff] }
  0x1c   :  { %v110_v12 = vpack.c.bf16 %v87_v10, %v86_v9  ;;  %v89_v14 = vld [vmem:[%s1864_s1 + $0x98] sm:$0xff]  ;;  %v90_v15 = vld [vmem:[%s1864_s1 + $0xa0] sm:$0xff]  ;;  %v91_v16 = vld [vmem:[%s1864_s1 + $0xa8] sm:$0xff] }
  0x1d   :  { %v111_v17 = vpack.c.bf16 %v89_v14, %v88_v13  ;;  %v112_v18 = vpack.c.bf16 %v91_v16, %v90_v15  ;;  %v92_v19 = vld [vmem:[%s1864_s1 + $0xb0] sm:$0xff]  ;;  %v93_v20 = vld [vmem:[%s1864_s1 + $0xb8] sm:$0xff]  ;;  %v94_v21 = vld [vmem:[%s1864_s1 + $0xc0] sm:$0xff] }
  0x1e   :  { %v95_v22 = vld [vmem:[%s1864_s1 + $0xc8] sm:$0xff]  ;;  %v113_v23 = vpack.c.bf16 %v93_v20, %v92_v19  ;;  %v96_v25 = vld [vmem:[%s1864_s1 + $0xd0] sm:$0xff]  ;;  %v97_v26 = vld [vmem:[%s1864_s1 + $0xd8] sm:$0xff] }
  0x1f   :  { %v114_v24 = vpack.c.bf16 %v95_v22, %v94_v21  ;;  %v98_v27 = vld [vmem:[%s1864_s1 + $0xe0] sm:$0xff]  ;;  %v99_v28 = vld [vmem:[%s1864_s1 + $0xe8] sm:$0xff]  ;;  %v115_v29 = vpack.c.bf16 %v97_v26, %v96_v25  ;;  %v100_v31 = vld [vmem:[%s1864_s1 + $0xf0] sm:$0xff] }
  0x20   :  { %v116_v30 = vpack.c.bf16 %v99_v28, %v98_v27  ;;  %v101_v32 = vld [vmem:[%s1864_s1 + $0xf8] sm:$0xff]  ;;  %v656_v34 = vld [vmem:[%s1867_s4] sm:$0xff]  ;;  %v657_v35 = vld [vmem:[%s1867_s4 + $0x8] sm:$0xff] }
  0x21   :  { %v117_v33 = vpack.c.bf16 %v101_v32, %v100_v31  ;;  %v1345_v36 = vpack.c.bf16 %v657_v35, %v656_v34  ;;  %v658_v37 = vld [vmem:[%s1867_s4 + $0x10] sm:$0xff]  ;;  %v659_v38 = vld [vmem:[%s1867_s4 + $0x18] sm:$0xff]  ;;  %v660_v40 = vld [vmem:[%s1867_s4 + $0x20] sm:$0xff] }
  0x22   :  { %1242 = vmatmul.mubr.msk.bf16.gmra.mrb[12].mxu1 %vm141_vm0, %v69_v50  ;;  %1226 = vmatmul.mubr.msk.bf16.gmra.mrb[12].mxu0 %vm141_vm0, %v61_v52  ;;  %v1349_v39 = vpack.c.bf16 %v659_v38, %v658_v37  ;;  %v661_v41 = vld [vmem:[%s1867_s4 + $0x28] sm:$0xff]  ;;  %v662_v43 = vld [vmem:[%s1867_s4 + $0x30] sm:$0xff]  ;;  %v663_v44 = vld [vmem:[%s1867_s4 + $0x38] sm:$0xff] }
  0x23   :  { %1249 = vmatprep.mubr.msk.bf16.mxu1 %vm141_vm0, %v102_v51  ;;  %1346 = vmatprep.subr.bf16.mxu0 %v1345_v36  ;;  %v1353_v42 = vpack.c.bf16 %v661_v41, %v660_v40  ;;  %v1357_v45 = vpack.c.bf16 %v663_v44, %v662_v43 }
  0x24   :  { %1348 = vmatpush3.bf16.msra.mxu0 %v1345_v36 }
  0x25   :  { %1350 = vmatprep.subr.bf16.mxu0 %v1349_v39 }
  0x28   :  { %1352 = vmatpush3.bf16.msra.mxu0 %v1349_v39 }
  0x29   :  { %1354 = vmatprep.subr.bf16.mxu0 %v1353_v42 }
  0x2a   :  { %1250 = vmatmul.mubr.msk.bf16.vlgmr.msra.gmra.mrb[16].mxu1 %vm141_vm0, %v103_v57 }
  0x2b   :  { %1253 = vmatprep.mubr.msk.bf16.mxu1 %vm141_vm0, %v104_v58 }
  0x2c   :  { %1356 = vmatpush3.bf16.msra.mxu0 %v1353_v42 }
  0x2d   :  { %1358 = vmatprep.subr.bf16.mxu0 %v1357_v45 }
  0x30   :  { %1360 = vmatpush3.bf16.msra.mxu0 %v1357_v45 }
  0x32   :  { %1254 = vmatmul.mubr.msk.bf16.gmra.mrb[20].mxu1 %vm141_vm0, %v105_v63 }
  0x33   :  { %1257 = vmatprep.mubr.msk.bf16.mxu1 %vm141_vm0, %v106_v0 }
  0x3a   :  { %1258 = vmatmul.mubr.msk.bf16.gmra.mrb[24].mxu1 %vm141_vm0, %v107_v5 }
  0x3b   :  { %1261 = vmatprep.mubr.msk.bf16.mxu1 %vm141_vm0, %v108_v6 }
  0x42   :  { %1262 = vmatmul.mubr.msk.bf16.gmra.mrb[28].mxu1 %vm141_vm0, %v109_v11 }
  0x43   :  { %1265 = vmatprep.mubr.msk.bf16.mxu1 %vm141_vm0, %v110_v12  ;;  %v1726_v12 = vld [vmem:[%s1866_s3] ss:$0 sm:$0xff]  ;;  %s1394_s3 = smov [#allocation2]  }
  0x44   :  { %s1055_s7 = sshll.u32 %s1394_s3, 4  ;;  %s1056_s7 = int_to_ptr.vmem [resolvable:$true] %s1055_s7 }
  0x45   :  { %s1370_s8 = scalar_lea.vmem %s1056_s7, 4096  ;;  %p1375_p1 = scmp.lt.s32.totalorder %s1056_s7, %s1056_s7 }
  0x46   :  { %p1371_p0 = scmp.ne.s32.totalorder %s1056_s7, %s1370_s8  ;;  %p1376_p2 = scmp.lt.s32.totalorder %s1370_s8, %s1370_s8 }
  0x48   :  { %p1377_p3 = por %p1376_p2, %p1375_p1 }
  0x4a   :  { %1266 = vmatmul.mubr.msk.bf16.gmra.mrb[32].mxu1 %vm141_vm0, %v111_v17  ;;  %p1378_p4 = pnand %p1377_p3, %p1371_p0 }
  0x4b   :  { %1269 = vmatprep.mubr.msk.bf16.mxu1 %vm141_vm0, %v112_v18 }
  0x52   :  { %1270 = vmatmul.mubr.msk.bf16.gmra.mrb[36].mxu1 %vm141_vm0, %v113_v23 }
  0x53   :  { %1273 = vmatprep.mubr.msk.bf16.mxu1 %vm141_vm0, %v114_v24 }
  0x5a   :  { %1274 = vmatmul.mubr.msk.bf16.gmra.mrb[40].mxu1 %vm141_vm0, %v115_v29 }
  0x5b   :  { %1277 = vmatprep.mubr.msk.bf16.mxu1 %vm141_vm0, %v116_v30 }
  0x62   :  { %1278 = vmatmul.mubr.msk.bf16.gmra.mrb[44].mxu1 %vm141_vm0, %v117_v33 }
  0xdd   :  { %v1681_v46 = vpop.f32.mrb[0].mxu1  ;;  %v1215_v49 = vpop.f32.mrb[0].mxu0 }
  0xde   :  { %v1683_v47 = vpop.f32.mrb[1].mxu1  ;;  %v224_v51 = vpop.f32.mrb[1].mxu0  ;;  %v233_v14 = vadd.f32 %v1215_v49, %v1726_v12 }
  0xdf   :  { %v1685_v48 = vpop.f32.mrb[2].mxu1  ;;  %v1216_v52 = vpop.f32.mrb[2].mxu0  ;;  %v225_v16 = vadd.f32 %v1726_v12, %v224_v51 }
  0xe0   :  { %v1687_v50 = vpop.f32.mrb[3].mxu1  ;;  %v227_v53 = vpop.f32.mrb[3].mxu0  ;;  %v353_v18 = vmax.f32 %v233_v14, 0.0  ;;  %v236_v19 = vadd.f32 %v1216_v52, %v1726_v12 }
  0xe1   :  { %v351_v22 = vmax.f32 %v225_v16, 0.0  ;;  %v228_v23 = vadd.f32 %v1726_v12, %v227_v53 }
  0xe2   :  { %v354_v31 = vmax.f32 %v236_v19, 0.0 }
  0xe3   :  { %v352_v35 = vmax.f32 %v228_v23, 0.0 }
  0xe5   :  { %v1689_v54 = vpop.f32.mrb[4].mxu1  ;;  %v1219_v57 = vpop.f32.mrb[4].mxu0 }
  0xe6   :  { %v1691_v55 = vpop.f32.mrb[5].mxu1  ;;  %v240_v59 = vpop.f32.mrb[5].mxu0  ;;  %v249_v34 = vadd.f32 %v1219_v57, %v1726_v12 }
  0xe7   :  { %v1693_v56 = vpop.f32.mrb[6].mxu1  ;;  %v1220_v60 = vpop.f32.mrb[6].mxu0  ;;  %v241_v38 = vadd.f32 %v1726_v12, %v240_v59 }
  0xe8   :  { %v1695_v58 = vpop.f32.mrb[7].mxu1  ;;  %v243_v61 = vpop.f32.mrb[7].mxu0  ;;  %v357_v42 = vmax.f32 %v249_v34, 0.0  ;;  %v252_v43 = vadd.f32 %v1220_v60, %v1726_v12 }
  0xe9   :  { %v355_v49 = vmax.f32 %v241_v38, 0.0  ;;  %v244_v51 = vadd.f32 %v1726_v12, %v243_v61 }
  0xeb   :  { %v356_v61 = vmax.f32 %v244_v51, 0.0 }
  0xed   :  { %v1697_v62 = vpop.f32.mrb[8].mxu1  ;;  %v1223_v1 = vpop.f32.mrb[8].mxu0 }
  0xee   :  { %v1699_v63 = vpop.f32.mrb[9].mxu1  ;;  %v1705_v3 = vpop.f32.mrb[9].mxu0 }
  0xef   :  { %v1701_v0 = vpop.f32.mrb[10].mxu1  ;;  %v1707_v4 = vpop.f32.mrb[10].mxu0  ;;  %v257_v23 = vadd.f32 %v1726_v12, %v1705_v3 }
  0xf0   :  { %v1703_v2 = vpop.f32.mrb[11].mxu1  ;;  %v1709_v5 = vpop.f32.mrb[11].mxu0 }
  0xf5   :  { %v1711_v6 = vpop.f32.mrb[12].mxu1  ;;  %v1717_v9 = vpop.f32.mrb[12].mxu0 }
  0xf6   :  { %v1713_v7 = vpop.f32.mrb[13].mxu1  ;;  %v1721_v11 = vpop.f32.mrb[13].mxu0 }
  0xf7   :  { %v1715_v8 = vpop.f32.mrb[14].mxu1  ;;  %v1728_v13 = vpop.f32.mrb[14].mxu0 }
  0xf8   :  { %v1719_v10 = vpop.f32.mrb[15].mxu1  ;;  %v1731_v15 = vpop.f32.mrb[15].mxu0 }
  0xfd   :  { %v1251_v17 = vpop.f32.mrb[16].mxu1 }
  0xfe   :  { %v474_v20 = vadd.f32 %v1251_v17, %v1726_v12  ;;  %v465_v21 = vpop.f32.mrb[17].mxu1  ;;  %v358_v17 = vmax.f32 %v252_v43, 0.0  ;;  %v273_v43 = vadd.f32 %v1726_v12, %v1721_v11 }
  0xff   :  { %v466_v24 = vadd.f32 %v1726_v12, %v465_v21  ;;  %v1252_v25 = vpop.f32.mrb[18].mxu1 }
 0x100   :  { %v594_v26 = vmax.f32 %v474_v20, 0.0  ;;  %v477_v27 = vadd.f32 %v1252_v25, %v1726_v12  ;;  %v468_v28 = vpop.f32.mrb[19].mxu1  ;;  %v265_v20 = vadd.f32 %v1223_v1, %v1726_v12 }
 0x101   :  { %v592_v29 = vmax.f32 %v466_v24, 0.0  ;;  %v469_v30 = vadd.f32 %v1726_v12, %v468_v28  ;;  %v268_v28 = vadd.f32 %v1707_v4, %v1726_v12 }
 0x102   :  { %v626_v32 = vsub.f32 %v594_v26, %v353_v18  ;;  %v595_v33 = vmax.f32 %v477_v27, 0.0  ;;  %v361_v27 = vmax.f32 %v265_v20, 0.0 }
 0x103   :  { %v624_v36 = vsub.f32 %v592_v29, %v351_v22  ;;  %v593_v37 = vmax.f32 %v469_v30, 0.0  ;;  %v359_v30 = vmax.f32 %v257_v23, 0.0  ;;  %v297_v23 = vadd.f32 %v1681_v46, %v1726_v12 }
 0x104   :  { %v627_v39 = vsub.f32 %v595_v33, %v354_v31  ;;  %v260_v31 = vadd.f32 %v1726_v12, %v1709_v5  ;;  %v281_v5 = vadd.f32 %v1717_v9, %v1726_v12 }
 0x105   :  { %v625_v40 = vsub.f32 %v593_v37, %v352_v35  ;;  %v1255_v41 = vpop.f32.mrb[20].mxu1  ;;  %1297 = vmatprep.mubr.msk.f32.mxu0 %vm664_vm1, %v624_v36  ;;  %v362_v37 = vmax.f32 %v268_v28, 0.0  ;;  %v300_v28 = vadd.f32 %v1685_v48, %v1726_v12 }
 0x106   :  { %v490_v44 = vadd.f32 %v1255_v41, %v1726_v12  ;;  %v481_v45 = vpop.f32.mrb[21].mxu1  ;;  %v365_v51 = vmax.f32 %v281_v5, 0.0  ;;  %v313_v5 = vadd.f32 %v1689_v54, %v1726_v12 }
 0x107   :  { %v482_v52 = vadd.f32 %v1726_v12, %v481_v45  ;;  %v1256_v53 = vpop.f32.mrb[22].mxu1  ;;  %1298 = vmatmul.mubr.msk.f32.vlgmr.msra.gmra.mrb[16].mxu0 %vm664_vm1, %v625_v40  ;;  %v360_v40 = vmax.f32 %v260_v31, 0.0 }
 0x108   :  { %v598_v57 = vmax.f32 %v490_v44, 0.0  ;;  %v493_v59 = vadd.f32 %v1256_v53, %v1726_v12  ;;  %v484_v14 = vpop.f32.mrb[23].mxu1  ;;  %1300 = vmatprep.mubr.msk.f32.mxu0 %vm664_vm1, %v626_v32 }
 0x109   :  { %v596_v16 = vmax.f32 %v482_v52, 0.0  ;;  %v485_v60 = vadd.f32 %v1726_v12, %v484_v14  ;;  %v284_v52 = vadd.f32 %v1728_v13, %v1726_v12 }
 0x10a   :  { %v630_v18 = vsub.f32 %v598_v57, %v357_v42  ;;  %v599_v19 = vmax.f32 %v493_v59, 0.0  ;;  %v363_v57 = vmax.f32 %v273_v43, 0.0  ;;  %v276_v59 = vadd.f32 %v1726_v12, %v1731_v15 }
 0x10b   :  { %v628_v21 = vsub.f32 %v596_v16, %v355_v49  ;;  %v597_v22 = vmax.f32 %v485_v60, 0.0  ;;  %1301 = vmatmul.mubr.msk.f32.gmra.mrb[18].mxu0 %vm664_vm1, %v627_v39 }
 0x10c   :  { %v631_v24 = vsub.f32 %v599_v19, %v358_v17  ;;  %v366_v19 = vmax.f32 %v284_v52, 0.0 }
 0x10d   :  { %v629_v25 = vsub.f32 %v597_v22, %v356_v61  ;;  %v1259_v26 = vpop.f32.mrb[24].mxu1  ;;  %1303 = vmatprep.mubr.msk.f32.mxu0 %vm664_vm1, %v628_v21  ;;  %v364_v21 = vmax.f32 %v276_v59, 0.0 }
 0x10e   :  { %v506_v29 = vadd.f32 %v1259_v26, %v1726_v12  ;;  %v497_v1 = vpop.f32.mrb[25].mxu1 }
 0x10f   :  { %v498_v32 = vadd.f32 %v1726_v12, %v497_v1  ;;  %v1260_v33 = vpop.f32.mrb[26].mxu1  ;;  %1304 = vmatmul.mubr.msk.f32.gmra.mrb[20].mxu0 %vm664_vm1, %v629_v25  ;;  %v289_v25 = vadd.f32 %v1726_v12, %v1683_v47 }
 0x110   :  { %v602_v3 = vmax.f32 %v506_v29, 0.0  ;;  %v509_v34 = vadd.f32 %v1260_v33, %v1726_v12  ;;  %v500_v35 = vpop.f32.mrb[27].mxu1  ;;  %1306 = vmatprep.mubr.msk.f32.mxu0 %vm664_vm1, %v630_v18 }
 0x111   :  { %v600_v36 = vmax.f32 %v498_v32, 0.0  ;;  %v501_v4 = vadd.f32 %v1726_v12, %v500_v35  ;;  %v369_v32 = vmax.f32 %v297_v23, 0.0 }
 0x112   :  { %v634_v38 = vsub.f32 %v602_v3, %v361_v27  ;;  %v603_v39 = vmax.f32 %v509_v34, 0.0  ;;  %v367_v34 = vmax.f32 %v289_v25, 0.0 }
 0x113   :  { %v632_v41 = vsub.f32 %v600_v36, %v359_v30  ;;  %v601_v42 = vmax.f32 %v501_v4, 0.0  ;;  %1307 = vmatmul.mubr.msk.f32.gmra.mrb[22].mxu0 %vm664_vm1, %v631_v24  ;;  %v292_v30 = vadd.f32 %v1726_v12, %v1687_v50  ;;  %v370_v36 = vmax.f32 %v300_v28, 0.0 }
 0x114   :  { %v635_v44 = vsub.f32 %v603_v39, %v362_v37 }
 0x115   :  { %v633_v45 = vsub.f32 %v601_v42, %v360_v40  ;;  %v1263_v49 = vpop.f32.mrb[28].mxu1  ;;  %1309 = vmatprep.mubr.msk.f32.mxu0 %vm664_vm1, %v632_v41  ;;  %v368_v50 = vmax.f32 %v292_v30, 0.0  ;;  %v305_v41 = vadd.f32 %v1726_v12, %v1691_v55 }
 0x116   :  { %v522_v53 = vadd.f32 %v1263_v49, %v1726_v12  ;;  %v513_v9 = vpop.f32.mrb[29].mxu1 }
 0x117   :  { %v514_v14 = vadd.f32 %v1726_v12, %v513_v9  ;;  %v1264_v16 = vpop.f32.mrb[30].mxu1  ;;  %1310 = vmatmul.mubr.msk.f32.gmra.mrb[24].mxu0 %vm664_vm1, %v633_v45  ;;  %v371_v59 = vmax.f32 %v305_v41, 0.0 }
 0x118   :  { %v606_v11 = vmax.f32 %v522_v53, 0.0  ;;  %v525_v60 = vadd.f32 %v1264_v16, %v1726_v12  ;;  %v516_v17 = vpop.f32.mrb[31].mxu1  ;;  %1312 = vmatprep.mubr.msk.f32.mxu0 %vm664_vm1, %v634_v38  ;;  %v373_v53 = vmax.f32 %v313_v5, 0.0 }
 0x119   :  { %v604_v18 = vmax.f32 %v514_v14, 0.0  ;;  %v517_v13 = vadd.f32 %v1726_v12, %v516_v17 }
 0x11a   :  { %v638_v20 = vsub.f32 %v606_v11, %v365_v51  ;;  %v607_v61 = vmax.f32 %v525_v60, 0.0  ;;  %v308_v51 = vadd.f32 %v1726_v12, %v1695_v58 }
 0x11b   :  { %v636_v22 = vsub.f32 %v604_v18, %v363_v57  ;;  %v605_v15 = vmax.f32 %v517_v13, 0.0  ;;  %1313 = vmatmul.mubr.msk.f32.gmra.mrb[26].mxu0 %vm664_vm1, %v635_v44  ;;  %v316_v44 = vadd.f32 %v1693_v56, %v1726_v12  ;;  %v329_v13 = vadd.f32 %v1697_v62, %v1726_v12 }
 0x11c   :  { %v639_v24 = vsub.f32 %v607_v61, %v366_v19  ;;  %v372_v58 = vmax.f32 %v308_v51, 0.0 }
 0x11d   :  { %v637_v26 = vsub.f32 %v605_v15, %v364_v21  ;;  %v1267_v27 = vpop.f32.mrb[32].mxu1  ;;  %1315 = vmatprep.mubr.msk.f32.mxu0 %vm664_vm1, %v636_v22  ;;  %v374_v16 = vmax.f32 %v316_v44, 0.0  ;;  %v332_v22 = vadd.f32 %v1701_v0, %v1726_v12 }
 0x11e   :  { %v538_v29 = vadd.f32 %v1267_v27, %v1726_v12  ;;  %v529_v1 = vpop.f32.mrb[33].mxu1 }
 0x11f   :  { %v530_v31 = vadd.f32 %v1726_v12, %v529_v1  ;;  %v1268_v46 = vpop.f32.mrb[34].mxu1  ;;  %1316 = vmatmul.mubr.msk.f32.gmra.mrb[28].mxu0 %vm664_vm1, %v637_v26  ;;  %v377_v26 = vmax.f32 %v329_v13, 0.0  ;;  %v378_v30 = vmax.f32 %v332_v22, 0.0 }
 0x120   :  { %v610_v47 = vmax.f32 %v538_v29, 0.0  ;;  %v541_v33 = vadd.f32 %v1268_v46, %v1726_v12  ;;  %v532_v3 = vpop.f32.mrb[35].mxu1  ;;  %1318 = vmatprep.mubr.msk.f32.mxu0 %vm664_vm1, %v638_v20  ;;  %v321_v20 = vadd.f32 %v1726_v12, %v1699_v63 }
 0x121   :  { %v608_v48 = vmax.f32 %v530_v31, 0.0  ;;  %v533_v35 = vadd.f32 %v1726_v12, %v532_v3 }
 0x122   :  { %v642_v4 = vsub.f32 %v610_v47, %v369_v32  ;;  %v611_v37 = vmax.f32 %v541_v33, 0.0  ;;  %v375_v29 = vmax.f32 %v321_v20, 0.0  ;;  %v345_v33 = vadd.f32 %v1711_v6, %v1726_v12 }
 0x123   :  { %v640_v38 = vsub.f32 %v608_v48, %v367_v34  ;;  %v609_v39 = vmax.f32 %v533_v35, 0.0  ;;  %1319 = vmatmul.mubr.msk.f32.gmra.mrb[30].mxu0 %vm664_vm1, %v639_v24  ;;  %v324_v24 = vadd.f32 %v1726_v12, %v1703_v2  ;;  %v337_v34 = vadd.f32 %v1726_v12, %v1713_v7 }
 0x124   :  { %v643_v40 = vsub.f32 %v611_v37, %v370_v36  ;;  %v348_v36 = vadd.f32 %v1715_v8, %v1726_v12 }
 0x125   :  { %v641_v42 = vsub.f32 %v609_v39, %v368_v50  ;;  %v1271_v43 = vpop.f32.mrb[36].mxu1  ;;  %1321 = vmatprep.mubr.msk.f32.mxu0 %vm664_vm1, %v640_v38  ;;  %v376_v2 = vmax.f32 %v324_v24, 0.0  ;;  %v340_v50 = vadd.f32 %v1726_v12, %v1719_v10  ;;  %v381_v39 = vmax.f32 %v345_v33, 0.0 }
 0x126   :  { %v554_v45 = vadd.f32 %v1271_v43, %v1726_v12  ;;  %v545_v49 = vpop.f32.mrb[37].mxu1  ;;  %v379_v41 = vmax.f32 %v337_v34, 0.0  ;;  %v382_v43 = vmax.f32 %v348_v36, 0.0 }
 0x127   :  { %v546_v52 = vadd.f32 %v1726_v12, %v545_v49  ;;  %v1272_v54 = vpop.f32.mrb[38].mxu1  ;;  %1322 = vmatmul.mubr.msk.f32.gmra.mrb[32].mxu0 %vm664_vm1, %v641_v42  ;;  %v380_v10 = vmax.f32 %v340_v50, 0.0 }
 0x128   :  { %v614_v55 = vmax.f32 %v554_v45, 0.0  ;;  %v557_v9 = vadd.f32 %v1272_v54, %v1726_v12  ;;  %v548_v57 = vpop.f32.mrb[39].mxu1  ;;  %1324 = vmatprep.mubr.msk.f32.mxu0 %vm664_vm1, %v642_v4 }
 0x129   :  { %v612_v56 = vmax.f32 %v546_v52, 0.0  ;;  %v549_v14 = vadd.f32 %v1726_v12, %v548_v57 }
 0x12a   :  { %v646_v11 = vsub.f32 %v614_v55, %v373_v53  ;;  %v615_v60 = vmax.f32 %v557_v9, 0.0 }
 0x12b   :  { %v644_v17 = vsub.f32 %v612_v56, %v371_v59  ;;  %v613_v18 = vmax.f32 %v549_v14, 0.0  ;;  %1325 = vmatmul.mubr.msk.f32.gmra.mrb[34].mxu0 %vm664_vm1, %v643_v40 }
 0x12c   :  { %v647_v19 = vsub.f32 %v615_v60, %v374_v16 }
 0x12d   :  { %v645_v61 = vsub.f32 %v613_v18, %v372_v58  ;;  %v1275_v21 = vpop.f32.mrb[40].mxu1  ;;  %1327 = vmatprep.mubr.msk.f32.mxu0 %vm664_vm1, %v644_v17 }
 0x12e   :  { %v570_v15 = vadd.f32 %v1275_v21, %v1726_v12  ;;  %v561_v23 = vpop.f32.mrb[41].mxu1 }
 0x12f   :  { %v562_v25 = vadd.f32 %v1726_v12, %v561_v23  ;;  %v1276_v62 = vpop.f32.mrb[42].mxu1  ;;  %1328 = vmatmul.mubr.msk.f32.gmra.mrb[36].mxu0 %vm664_vm1, %v645_v61 }
 0x130   :  { %v618_v63 = vmax.f32 %v570_v15, 0.0  ;;  %v573_v27 = vadd.f32 %v1276_v62, %v1726_v12  ;;  %v564_v28 = vpop.f32.mrb[43].mxu1  ;;  %1330 = vmatprep.mubr.msk.f32.mxu0 %vm664_vm1, %v646_v11 }
 0x131   :  { %v616_v0 = vmax.f32 %v562_v25, 0.0  ;;  %v565_v1 = vadd.f32 %v1726_v12, %v564_v28 }
 0x132   :  { %v650_v31 = vsub.f32 %v618_v63, %v377_v26  ;;  %v619_v46 = vmax.f32 %v573_v27, 0.0 }
 0x133   :  { %v648_v32 = vsub.f32 %v616_v0, %v375_v29  ;;  %v617_v47 = vmax.f32 %v565_v1, 0.0  ;;  %1331 = vmatmul.mubr.msk.f32.gmra.mrb[38].mxu0 %vm664_vm1, %v647_v19 }
 0x134   :  { %v651_v3 = vsub.f32 %v619_v46, %v378_v30 }
 0x135   :  { %v649_v48 = vsub.f32 %v617_v47, %v376_v2  ;;  %v1279_v35 = vpop.f32.mrb[44].mxu1  ;;  %1333 = vmatprep.mubr.msk.f32.mxu0 %vm664_vm1, %v648_v32 }
 0x136   :  { %v586_v4 = vadd.f32 %v1279_v35, %v1726_v12  ;;  %v577_v37 = vpop.f32.mrb[45].mxu1 }
 0x137   :  { %v578_v38 = vadd.f32 %v1726_v12, %v577_v37  ;;  %v1280_v6 = vpop.f32.mrb[46].mxu1  ;;  %1334 = vmatmul.mubr.msk.f32.gmra.mrb[40].mxu0 %vm664_vm1, %v649_v48 }
 0x138   :  { %v622_v7 = vmax.f32 %v586_v4, 0.0  ;;  %v589_v5 = vadd.f32 %v1280_v6, %v1726_v12  ;;  %v580_v40 = vpop.f32.mrb[47].mxu1  ;;  %1336 = vmatprep.mubr.msk.f32.mxu0 %vm664_vm1, %v650_v31 }
 0x139   :  { %v620_v8 = vmax.f32 %v578_v38, 0.0  ;;  %v581_v42 = vadd.f32 %v1726_v12, %v580_v40 }
 0x13a   :  { %v654_v44 = vsub.f32 %v622_v7, %v381_v39  ;;  %v623_v45 = vmax.f32 %v589_v5, 0.0 }
 0x13b   :  { %v652_v49 = vsub.f32 %v620_v8, %v379_v41  ;;  %v621_v51 = vmax.f32 %v581_v42, 0.0  ;;  %1337 = vmatmul.mubr.msk.f32.gmra.mrb[42].mxu0 %vm664_vm1, %v651_v3 }
 0x13c   :  { %v655_v52 = vsub.f32 %v623_v45, %v382_v43 }
 0x13d   :  { %v653_v54 = vsub.f32 %v621_v51, %v380_v10  ;;  %1339 = vmatprep.mubr.msk.f32.mxu0 %vm664_vm1, %v652_v49 }
 0x13f   :  { %1340 = vmatmul.mubr.msk.f32.gmra.mrb[44].mxu0 %vm664_vm1, %v653_v54 }
 0x140   :  { %1342 = vmatprep.mubr.msk.f32.mxu0 %vm664_vm1, %v654_v44 }
 0x143   :  { %1343 = vmatmul.mubr.msk.f32.gmra.mrb[46].mxu0 %vm664_vm1, %v655_v52 }
 0x1da   :  { %v1299_v53 = vpop.f32.mrb[16].mxu0 }
 0x1db   :  { %v987_v12 = vmul.f32 23.061, %v1299_v53  ;;  %v827_v55 = vpop.f32.mrb[17].mxu0 }
 0x1dc   :  { %v986_v9 = vmul.f32 23.061, %v827_v55 }
 0x1dd   :  { %1019 = vst [vmem:[#allocation2 + $0x8] sm:$0xff] %v987_v12 }
 0x1de   :  { %1018 = vst [vmem:[#allocation2] sm:$0xff] %v986_v9  ;;  %v1302_v57 = vpop.f32.mrb[18].mxu0 }
 0x1df   :  { %v989_v59 = vmul.f32 23.061, %v1302_v57  ;;  %v837_v56 = vpop.f32.mrb[19].mxu0 }
 0x1e0   :  { %v988_v14 = vmul.f32 23.061, %v837_v56 }
 0x1e1   :  { %1021 = vst [vmem:[#allocation2 + $0x18] sm:$0xff] %v989_v59 }
 0x1e2   :  { %1020 = vst [vmem:[#allocation2 + $0x10] sm:$0xff] %v988_v14  ;;  %v1305_v16 = vpop.f32.mrb[20].mxu0 }
 0x1e3   :  { %v991_v11 = vmul.f32 23.061, %v1305_v16  ;;  %v847_v60 = vpop.f32.mrb[21].mxu0 }
 0x1e4   :  { %v990_v58 = vmul.f32 23.061, %v847_v60 }
 0x1e5   :  { %1023 = vst [vmem:[#allocation2 + $0x28] sm:$0xff] %v991_v11 }
 0x1e6   :  { %1022 = vst [vmem:[#allocation2 + $0x20] sm:$0xff] %v990_v58  ;;  %v1308_v17 = vpop.f32.mrb[22].mxu0 }
 0x1e7   :  { %v993_v18 = vmul.f32 23.061, %v1308_v17  ;;  %v857_v13 = vpop.f32.mrb[23].mxu0 }
 0x1e8   :  { %v992_v19 = vmul.f32 23.061, %v857_v13 }
 0x1e9   :  { %1025 = vst [vmem:[#allocation2 + $0x38] sm:$0xff] %v993_v18 }
 0x1ea   :  { %1024 = vst [vmem:[#allocation2 + $0x30] sm:$0xff] %v992_v19  ;;  %v1311_v20 = vpop.f32.mrb[24].mxu0 }
 0x1eb   :  { %v995_v61 = vmul.f32 23.061, %v1311_v20  ;;  %v867_v21 = vpop.f32.mrb[25].mxu0 }
 0x1ec   :  { %v994_v22 = vmul.f32 23.061, %v867_v21 }
 0x1ed   :  { %1027 = vst [vmem:[#allocation2 + $0x48] sm:$0xff] %v995_v61 }
 0x1ee   :  { %1026 = vst [vmem:[#allocation2 + $0x40] sm:$0xff] %v994_v22  ;;  %v1314_v15 = vpop.f32.mrb[26].mxu0 }
 0x1ef   :  { %v997_v23 = vmul.f32 23.061, %v1314_v15  ;;  %v877_v24 = vpop.f32.mrb[27].mxu0 }
 0x1f0   :  { %v996_v25 = vmul.f32 23.061, %v877_v24 }
 0x1f1   :  { %1029 = vst [vmem:[#allocation2 + $0x58] sm:$0xff] %v997_v23 }
 0x1f2   :  { %1028 = vst [vmem:[#allocation2 + $0x50] sm:$0xff] %v996_v25  ;;  %v1317_v62 = vpop.f32.mrb[28].mxu0 }
 0x1f3   :  { %v999_v26 = vmul.f32 23.061, %v1317_v62  ;;  %v887_v63 = vpop.f32.mrb[29].mxu0 }
 0x1f4   :  { %v998_v27 = vmul.f32 23.061, %v887_v63 }
 0x1f5   :  { %1031 = vst [vmem:[#allocation2 + $0x68] sm:$0xff] %v999_v26 }
 0x1f6   :  { %1030 = vst [vmem:[#allocation2 + $0x60] sm:$0xff] %v998_v27  ;;  %v1320_v28 = vpop.f32.mrb[30].mxu0 }
 0x1f7   :  { %v1001_v29 = vmul.f32 23.061, %v1320_v28  ;;  %v897_v0 = vpop.f32.mrb[31].mxu0 }
 0x1f8   :  { %v1000_v1 = vmul.f32 23.061, %v897_v0 }
 0x1f9   :  { %1033 = vst [vmem:[#allocation2 + $0x78] sm:$0xff] %v1001_v29 }
 0x1fa   :  { %1032 = vst [vmem:[#allocation2 + $0x70] sm:$0xff] %v1000_v1  ;;  %v1323_v30 = vpop.f32.mrb[32].mxu0 }
 0x1fb   :  { %v1003_v31 = vmul.f32 23.061, %v1323_v30  ;;  %v907_v46 = vpop.f32.mrb[33].mxu0 }
 0x1fc   :  { %v1002_v2 = vmul.f32 23.061, %v907_v46 }
 0x1fd   :  { %1035 = vst [vmem:[#allocation2 + $0x88] sm:$0xff] %v1003_v31 }
 0x1fe   :  { %1034 = vst [vmem:[#allocation2 + $0x80] sm:$0xff] %v1002_v2  ;;  %v1326_v32 = vpop.f32.mrb[34].mxu0 }
 0x1ff   :  { %v1005_v47 = vmul.f32 23.061, %v1326_v32  ;;  %v917_v33 = vpop.f32.mrb[35].mxu0 }
 0x200   :  { %v1004_v3 = vmul.f32 23.061, %v917_v33 }
 0x201   :  { %1037 = vst [vmem:[#allocation2 + $0x98] sm:$0xff] %v1005_v47 }
 0x202   :  { %1036 = vst [vmem:[#allocation2 + $0x90] sm:$0xff] %v1004_v3  ;;  %v1329_v34 = vpop.f32.mrb[36].mxu0 }
 0x203   :  { %v1007_v48 = vmul.f32 23.061, %v1329_v34  ;;  %v927_v35 = vpop.f32.mrb[37].mxu0 }
 0x204   :  { %v1006_v36 = vmul.f32 23.061, %v927_v35 }
 0x205   :  { %1039 = vst [vmem:[#allocation2 + $0xa8] sm:$0xff] %v1007_v48 }
 0x206   :  { %1038 = vst [vmem:[#allocation2 + $0xa0] sm:$0xff] %v1006_v36  ;;  %v1332_v4 = vpop.f32.mrb[38].mxu0 }
 0x207   :  { %v1009_v37 = vmul.f32 23.061, %v1332_v4  ;;  %v937_v50 = vpop.f32.mrb[39].mxu0 }
 0x208   :  { %v1008_v38 = vmul.f32 23.061, %v937_v50 }
 0x209   :  { %1041 = vst [vmem:[#allocation2 + $0xb8] sm:$0xff] %v1009_v37 }
 0x20a   :  { %1040 = vst [vmem:[#allocation2 + $0xb0] sm:$0xff] %v1008_v38  ;;  %v1335_v6 = vpop.f32.mrb[40].mxu0 }
 0x20b   :  { %v1011_v39 = vmul.f32 23.061, %v1335_v6  ;;  %v947_v7 = vpop.f32.mrb[41].mxu0 }
 0x20c   :  { %v1010_v5 = vmul.f32 23.061, %v947_v7 }
 0x20d   :  { %1043 = vst [vmem:[#allocation2 + $0xc8] sm:$0xff] %v1011_v39 }
 0x20e   :  { %1042 = vst [vmem:[#allocation2 + $0xc0] sm:$0xff] %v1010_v5  ;;  %v1338_v40 = vpop.f32.mrb[42].mxu0 }
 0x20f   :  { %v1013_v41 = vmul.f32 23.061, %v1338_v40  ;;  %v957_v8 = vpop.f32.mrb[43].mxu0 }
 0x210   :  { %v1012_v42 = vmul.f32 23.061, %v957_v8 }
 0x211   :  { %1045 = vst [vmem:[#allocation2 + $0xd8] sm:$0xff] %v1013_v41 }
 0x212   :  { %1044 = vst [vmem:[#allocation2 + $0xd0] sm:$0xff] %v1012_v42  ;;  %v1341_v43 = vpop.f32.mrb[44].mxu0 }
 0x213   :  { %v1015_v44 = vmul.f32 23.061, %v1341_v43  ;;  %v967_v45 = vpop.f32.mrb[45].mxu0 }
 0x214   :  { %v1014_v10 = vmul.f32 23.061, %v967_v45 }
 0x215   :  { %1047 = vst [vmem:[#allocation2 + $0xe8] sm:$0xff] %v1015_v44 }
 0x216   :  { %1046 = vst [vmem:[#allocation2 + $0xe0] sm:$0xff] %v1014_v10  ;;  %v1344_v49 = vpop.f32.mrb[46].mxu0 }
 0x217   :  { %v1017_v51 = vmul.f32 23.061, %v1344_v49  ;;  %v977_v52 = vpop.f32.mrb[47].mxu0 }
 0x218   :  { %v1016_v54 = vmul.f32 23.061, %v977_v52 }
 0x219   :  { %1049 = vst [vmem:[#allocation2 + $0xf8] sm:$0xff] %v1017_v51 }
 0x21a   :  { %1048 = vst [vmem:[#allocation2 + $0xf0] sm:$0xff] %v1016_v54 }
 0x21b   :  { %1381 = shalt.err (!%p1378_p4)
}
 0x21c   :  { %s1382_s11 = scalar_lea.hbm %s1868_s5, 4096 }
 0x21d   :  { %p1383_p5 = scmp.ne.s32.totalorder %s1868_s5, %s1382_s11  ;;  %p1386_p6 = scmp.lt.u32.totalorder %s1382_s11, %s1868_s5 }
 0x21f   :  { %p1388_p7 = pnand %p1386_p6, %p1383_p5 }
 0x221   :  { %1391 = shalt.err (!%p1388_p7)
}
 0x222   :  { %s1395_s16 = smov 128   ;;  %s1396_s17 = smov 8  }
 0x223   :  { %1061 = dma.vmem_to_hbm [thread:$0]  %s1056_s7, 4096, %s1868_s5, [#allocation3], %s1395_s16, %s1395_s16, %s1396_s17  }
 0x224   :  { %1392 = dma.done.wait [#allocation3], 4096  }
 0x225   :  { %1393 = vsyncadd [#allocation3], 4294963200 }
 0x226   :  { %1065 = vsyncpa [#allocation3], 1 }

</bundles_post_ra>
